<compile_context>
chip_gen: v5e
topology: v5e:2x2
jax: 0.10.0
libtpu: 0.0.40
codegen_flags: <defaults>
</compile_context>

<pallas_src>
import functools

import jax
import jax.numpy as jnp
from jax.experimental import pallas as pl
from jax.experimental.pallas import tpu as pltpu


def _patch_embed_kernel(x_ref, w_ref, pos_ref, o_ref, *, precision):
    # x_ref:   (1, TP, K)  one tile of patch rows for one batch element
    # w_ref:   (K, E)      projection weight (stays VMEM-resident across grid)
    # pos_ref: (1, TP, E)  positional embedding with the conv bias folded in
    # o_ref:   (1, TP, E)
    y = jnp.dot(
        x_ref[0], w_ref[...],
        preferred_element_type=jnp.float32,
        precision=precision,
    )  # (TP, E) on the MXU
    o_ref[0] = (y + pos_ref[0]).astype(o_ref.dtype)


def _pick_tile(P, tile_p):
    """Largest multiple-of-8 tile <= tile_p, preferring one that divides P."""
    if P <= tile_p:
        return P  # full extent is always a legal block dim
    hi = max(8, (tile_p // 8) * 8)
    for cand in range(hi, 7, -8):  # prefer a divisor -> no ragged edge tile
        if P % cand == 0:
            return cand
    return hi  # ragged edge tile: still correct (masked writeback), just wasteful


def patch_embedding_forward(x, proj_w, proj_b, pos_embed, patch_size, *,
                            tile_p=1024, use_bf16=False, precision=None):
    """x: (B, C, H, W) float32 (NCHW, like the PyTorch module)."""
    B, C, H, W = x.shape
    ph, pw = patch_size
    E = proj_w.shape[0]
    assert H % ph == 0 and W % pw == 0
    Hp, Wp = H // ph, W // pw
    P = Hp * Wp
    K = C * ph * pw

    # --- patchify: stride=kernel Conv2d input windows as matmul rows ---------
    # (B, C, Hp, ph, Wp, pw) -> (B, Hp, Wp, C, ph, pw) -> (B, P, K)
    # Offered to XLA for fusion into the pallas_call input DMA (see
    # allow_input_fusion below) so it need not round-trip through HBM.
    xp = x.reshape(B, C, Hp, ph, Wp, pw)
    xp = jnp.transpose(xp, (0, 2, 4, 1, 3, 5)).reshape(B, P, K)

    # --- weight as (K, E); fold the conv bias into pos_embed -----------------
    w_kE = proj_w.reshape(E, K).T                     # out = xp @ w_kE
    pos_b = pos_embed + proj_b.reshape(1, 1, E)       # (1, P, E)

    if use_bf16:
        # Halves the dominant HBM read streams; f32 accumulate + f32 pos add.
        xp = xp.astype(jnp.bfloat16)
        w_kE = w_kE.astype(jnp.bfloat16)

    # --- tile the patch dimension --------------------------------------------
    TP = _pick_tile(P, tile_p)
    n_pt = pl.cdiv(P, TP)

    cost = pl.CostEstimate(
        flops=2 * B * P * K * E,
        transcendentals=0,
        # x read once, weight once, pos once, output written once.
        bytes_accessed=4 * (B * P * K + K * E + P * E + B * P * E),
    )

    kernel = functools.partial(_patch_embed_kernel, precision=precision)

    out = pl.pallas_call(
        kernel,
        out_shape=jax.ShapeDtypeStruct((B, P, E), jnp.float32),
        grid_spec=pltpu.PrefetchScalarGridSpec(
            num_scalar_prefetch=0,
            # Patch-tile axis OUTER, batch INNER: pos/weight block indices are
            # constant across the inner axis, so they are DMA'd once per patch
            # tile instead of once per (patch tile, batch element).
            grid=(n_pt, B),
            in_specs=[
                pl.BlockSpec((1, TP, K), lambda p, b: (b, p, 0)),   # patch rows
                pl.BlockSpec((K, E), lambda p, b: (0, 0)),          # weight
                pl.BlockSpec((1, TP, E), lambda p, b: (0, p, 0)),   # pos + bias
            ],
            out_specs=pl.BlockSpec((1, TP, E), lambda p, b: (b, p, 0)),
        ),
        compiler_params=pltpu.CompilerParams(
            dimension_semantics=("parallel", "arbitrary"),
            allow_input_fusion=[True, False, False],  # fuse patchify into DMA
            vmem_limit_bytes=48 * 1024 * 1024,
        ),
        cost_estimate=cost,
    )(xp, w_kE, pos_b)

    return out  # (B, P, E) — no padding, no post-call slice copy


def reference_forward(x, proj_w, proj_b, pos_embed, patch_size):
    """Pure-JAX reference identical to the PyTorch forward (norm=None)."""
    y = jax.lax.conv_general_dilated(
        x, proj_w, window_strides=patch_size, padding="VALID",
        dimension_numbers=("NCHW", "OIHW", "NCHW"),
        precision=jax.lax.Precision.HIGHEST)
    y = y + proj_b.reshape(1, -1, 1, 1)
    B, E, Hp, Wp = y.shape
    y = y.reshape(B, E, Hp * Wp).transpose(0, 2, 1)   # flatten(2).transpose(1,2)
    return y + pos_embed


if __name__ == "__main__":
    # Small shapes consistent with the module: img=16x16, patch=2x2,
    # in_chans=4, embed_dim=32, batch=2  ->  num_patches = 64, K = 16.
    B, C, H, W = 2, 4, 16, 16
    patch_size = (2, 2)
    E = 32
    P = (H // patch_size[0]) * (W // patch_size[1])

    key = jax.random.PRNGKey(0)
    kx, kw, kb, kp = jax.random.split(key, 4)
    x = jax.random.normal(kx, (B, C, H, W), dtype=jnp.float32)
    proj_w = jax.random.normal(kw, (E, C, patch_size[0], patch_size[1]),
                               dtype=jnp.float32) * 0.1
    proj_b = jax.random.normal(kb, (E,), dtype=jnp.float32) * 0.1
    # Module __init__ uses torch.zeros for pos_embed; use a deterministic
    # non-zero init so the addition path is actually exercised.
    pos_embed = jax.random.normal(kp, (1, P, E), dtype=jnp.float32) * 0.02

    out = patch_embedding_forward(x, proj_w, proj_b, pos_embed, patch_size)
    out = jax.block_until_ready(out)

    ref = reference_forward(x, proj_w, proj_b, pos_embed, patch_size)
    assert out.shape == (B, P, E)
    # Kernel matmul runs at the TPU's default (bf16-pass, f32-accumulate) MXU
    # precision while the reference conv is forced to HIGHEST, so allow a
    # bf16-level tolerance.
    assert jnp.allclose(out, ref, atol=5e-3, rtol=5e-3)

    print("KERNEL_OK")
</pallas_src>

<mosaic_0001>
module attributes {stable_mosaic.version = 11 : i64} {
  func.func @_patch_embed_kernel(%arg0: i32, %arg1: i32, %arg2: memref<1x64x16xf32, #tpu.memory_space<vmem>>, %arg3: memref<16x32xf32, #tpu.memory_space<vmem>>, %arg4: memref<1x64x32xf32, #tpu.memory_space<vmem>>, %arg5: memref<1x64x32xf32, #tpu.memory_space<vmem>>) attributes {dimension_semantics = [#tpu.dimension_semantics<parallel>, #tpu.dimension_semantics<arbitrary>], iteration_bounds = array<i64: 1, 2>, scalar_prefetch = 0 : i64, scratch_operands = 0 : i64, tpu.core_type = #tpu.core_type<tc>, window_params = [{transform_indices = @transform_0, window_bounds = array<i64: 1, 64, 16>}, {pipeline_mode = #tpu.pipeline_mode<synchronous>, transform_indices = @transform_1, window_bounds = array<i64: 16, 32>}, {transform_indices = @transform_2, window_bounds = array<i64: 1, 64, 32>}, {transform_indices = @transform_3, window_bounds = array<i64: 1, 64, 32>}]} {
    %c0 = arith.constant 0 : index
    %c0_0 = arith.constant 0 : index
    %c0_1 = arith.constant 0 : index
    %0 = vector.load %arg2[%c0, %c0_0, %c0_1] : memref<1x64x16xf32, #tpu.memory_space<vmem>>, vector<1x64x16xf32>
    %1 = vector.shape_cast %0 : vector<1x64x16xf32> to vector<64x16xf32>
    %c0_2 = arith.constant 0 : index
    %c0_3 = arith.constant 0 : index
    %2 = vector.load %arg3[%c0_2, %c0_3] : memref<16x32xf32, #tpu.memory_space<vmem>>, vector<16x32xf32>
    %cst = arith.constant dense<0.000000e+00> : vector<64x32xf32>
    %3 = tpu.matmul %1, %2, %cst {dimension_numbers = #tpu.dot_dimension_numbers<[1], [0], [0], [1], [0, 0, 1, 1], [], []>} : vector<64x16xf32>, vector<16x32xf32>, vector<64x32xf32> -> vector<64x32xf32>
    %c0_4 = arith.constant 0 : index
    %c0_5 = arith.constant 0 : index
    %c0_6 = arith.constant 0 : index
    %4 = vector.load %arg4[%c0_4, %c0_5, %c0_6] : memref<1x64x32xf32, #tpu.memory_space<vmem>>, vector<1x64x32xf32>
    %5 = vector.shape_cast %4 : vector<1x64x32xf32> to vector<64x32xf32>
    %6 = arith.addf %3, %5 : vector<64x32xf32>
    %c0_7 = arith.constant 0 : index
    %c0_8 = arith.constant 0 : index
    %c0_9 = arith.constant 0 : index
    %7 = vector.load %arg5[%c0_7, %c0_8, %c0_9] : memref<1x64x32xf32, #tpu.memory_space<vmem>>, vector<1x64x32xf32>
    %8 = vector.shape_cast %7 : vector<1x64x32xf32> to vector<64x32xf32>
    %9 = vector.shape_cast %6 : vector<64x32xf32> to vector<1x64x32xf32>
    tpu.vector_store %arg5[%c0_7, %c0_8, %c0_9], %9 {strides = array<i32>} : memref<1x64x32xf32, #tpu.memory_space<vmem>>, vector<1x64x32xf32>,
    return
  }
  func.func @transform_0(%arg0: i32, %arg1: i32) -> (i32, i32, i32) {
    %c0_i32 = arith.constant 0 : i32
    %c0_i32_0 = arith.constant 0 : i32
    return %arg1, %arg0, %c0_i32 : i32, i32, i32
  }
  func.func @transform_1(%arg0: i32, %arg1: i32) -> (i32, i32) {
    %c0_i32 = arith.constant 0 : i32
    %c0_i32_0 = arith.constant 0 : i32
    %c0_i32_1 = arith.constant 0 : i32
    return %c0_i32, %c0_i32_0 : i32, i32
  }
  func.func @transform_2(%arg0: i32, %arg1: i32) -> (i32, i32, i32) {
    %c0_i32 = arith.constant 0 : i32
    %c0_i32_0 = arith.constant 0 : i32
    %c0_i32_1 = arith.constant 0 : i32
    return %c0_i32, %arg0, %c0_i32_0 : i32, i32, i32
  }
  func.func @transform_3(%arg0: i32, %arg1: i32) -> (i32, i32, i32) {
    %c0_i32 = arith.constant 0 : i32
    %c0_i32_0 = arith.constant 0 : i32
    return %arg1, %arg0, %c0_i32 : i32, i32, i32
  }
}

</mosaic_0001>

<bundles_post_ra>
// kernel: tpu_custom_call.1
= control target key start
LH: loop header
LB: loop body
LE: loop exit
PB: predicated region body
PF: predicated region fallthrough
CT: control target
= control target key end

     0   :  { %s523_s12 = smov 0   ;;  %s525_s13 = smov 0   ;;  %s615_s0 = inlined_call_operand.vmem [shape: f32[2,64,16], index: 0, kind: input, shape index: {}]   ;;  %s616_s1 = inlined_call_operand.vmem [shape: f32[16,32], index: 1, kind: input, shape index: {}]   ;;  %s617_s2 = inlined_call_operand.vmem [shape: f32[1,64,32], index: 2, kind: input, shape index: {}]   ;;  %s618_s3 = inlined_call_operand.vmem [shape: f32[2,64,32], index: 3, kind: output, shape index: {}]  }
   0x1   :  { %s527_s14 = smov 0  }
   0x2 LB: > { %s22_s15 = sadd.s32 1, %s497_s13  ;;  %p432_p0 = scmp.ge.s32.totalorder %s501_s14, 1  ;;  %s501_s14 = sphi %s527_s14, %s13_s14   ;;  %s497_s13 = sphi %s525_s13, %s620_s13   ;;  %s493_s12 = sphi %s523_s12, %s619_s12  }
   0x3   : > { %p23_p1 = scmp.ge.s32.totalorder %s22_s15, 2  ;;  %p169_p2 = scmp.lt.s32.totalorder %s501_s14, 3 }
   0x5   : > { %s622_s15 = smov (%p23_p1, %s22_s15), 0  ;;  %p170_p3 = pnand %p432_p0, %p169_p2 }
   0x6   : > { %p207_p4 = scmp.lt.s32.totalorder (!%p170_p3), %s493_s12, 1 }
   0x7   : > { %173 = sbr.rel (%p170_p3) target bundleno = 161 (0xa1), region = 32 }
   0xc   : > { %v241_v0 = vld [vmem:[%s616_s1 + $0x8] sm:$0xff]  ;;  %v240_v1 = vld [vmem:[%s616_s1] sm:$0xff]  ;;  %s624_s12 = smov (!%p207_p4, %s493_s12), 1  ;;  %vm250_vm0 = vcmask 130048   ;;  %v244_v11 = vld [vmem:[%s617_s2 + $0x10] sm:$0xff]  ;;  %vm316_vm1 = vcmask 261120  }
   0xd   : > { %450 = vmatpush.msra.mxu2 %v241_v0  ;;  %451 = vmatpush.msra.mxu3 %v241_v0  ;;  %s447_s20 = sshll.u32 %s624_s12, 6  ;;  %v242_v10 = vld [vmem:[%s617_s2] sm:$0xff]  ;;  %v248_v17 = vld [vmem:[%s617_s2 + $0x30] sm:$0xff]  ;;  %v243_v22 = vld [vmem:[%s617_s2 + $0x8] sm:$0xff] }
   0xe   : > { %289 = vmatpush.msra.mxu0 %v241_v0  ;;  %449 = vmatpush.msra.mxu1 %v241_v0  ;;  %s214_s23 = scalar_lea.vmem %s615_s0, %s447_s20  ;;  %s570_s30 = scalar_lea.vmem %s618_s3, %s447_s20  ;;  %v246_v16 = vld [vmem:[%s617_s2 + $0x20] sm:$0xff]  ;;  %v245_v23 = vld [vmem:[%s617_s2 + $0x18] sm:$0xff]  ;;  %v247_v28 = vld [vmem:[%s617_s2 + $0x28] sm:$0xff] }
   0xf   : > { %453 = vmatpush.msra.mxu2 %v240_v1  ;;  %454 = vmatpush.msra.mxu3 %v240_v1  ;;  %v236_v2 = vld [vmem:[%s214_s23 + $0x20] sm:$0xff]  ;;  %v238_v3 = vld [vmem:[%s214_s23 + $0x30] sm:$0xff]  ;;  %v237_v6 = vld [vmem:[%s214_s23 + $0x28] sm:$0xff] }
  0x10   : > { %290 = vmatpush.msra.mxu0 %v240_v1  ;;  %452 = vmatpush.msra.mxu1 %v240_v1  ;;  %v232_v4 = vld [vmem:[%s214_s23] sm:$0xff]  ;;  %v234_v5 = vld [vmem:[%s214_s23 + $0x10] sm:$0xff]  ;;  %v239_v7 = vld [vmem:[%s214_s23 + $0x38] sm:$0xff] }
  0x11   : > { %441 = vmatmul.msk.f32.vlgmr.msra.gmra.mxu2 %vm250_vm0, %v236_v2  ;;  %443 = vmatmul.msk.f32.vlgmr.msra.gmra.mxu3 %vm250_vm0, %v238_v3  ;;  %v233_v8 = vld [vmem:[%s214_s23 + $0x8] sm:$0xff]  ;;  %v235_v9 = vld [vmem:[%s214_s23 + $0x18] sm:$0xff] }
  0x12   : > { %437 = vmatmul.msk.f32.vlgmr.msra.gmra.mxu0 %vm250_vm0, %v232_v4  ;;  %439 = vmatmul.msk.f32.vlgmr.msra.gmra.mxu1 %vm250_vm0, %v234_v5  ;;  %v249_v29 = vld [vmem:[%s617_s2 + $0x38] sm:$0xff] }
  0x19   : > { %442 = vmatmul.msk.f32.gmra.mxu2 %vm250_vm0, %v237_v6  ;;  %444 = vmatmul.msk.f32.gmra.mxu3 %vm250_vm0, %v239_v7 }
  0x1a   : > { %438 = vmatmul.msk.f32.gmra.mxu0 %vm250_vm0, %v233_v8  ;;  %440 = vmatmul.msk.f32.gmra.mxu1 %vm250_vm0, %v235_v9 }
  0x8f   : > { %v292_v12 = vpop.f32.mrf.mxu0  ;;  %v298_v13 = vpop.f32.mrf.mxu1 }
  0x90   : > { %v293_v14 = vadd.f32 %v292_v12, %v242_v10  ;;  %v299_v15 = vadd.f32 %v298_v13, %v244_v11 }
  0x92   : > { %317 = vst.msk [vmem:[%s570_s30] sm:$0xff] %vm316_vm1, %v293_v14 }
  0x93   : > { %319 = vst.msk [vmem:[%s570_s30 + $0x10] sm:$0xff] %vm316_vm1, %v299_v15 }
  0x94   : > { %v304_v18 = vpop.f32.mrf.mxu2  ;;  %v310_v19 = vpop.f32.mrf.mxu3 }
  0x95   : > { %v305_v20 = vadd.f32 %v304_v18, %v246_v16  ;;  %v311_v21 = vadd.f32 %v310_v19, %v248_v17 }
  0x97   : > { %321 = vst.msk [vmem:[%s570_s30 + $0x20] sm:$0xff] %vm316_vm1, %v305_v20  ;;  %v295_v24 = vpop.f32.mrf.mxu0  ;;  %v301_v25 = vpop.f32.mrf.mxu1 }
  0x98   : > { %323 = vst.msk [vmem:[%s570_s30 + $0x30] sm:$0xff] %vm316_vm1, %v311_v21  ;;  %v296_v26 = vadd.f32 %v295_v24, %v243_v22  ;;  %v302_v27 = vadd.f32 %v301_v25, %v245_v23 }
  0x9a   : > { %318 = vst.msk [vmem:[%s570_s30 + $0x8] sm:$0xff] %vm316_vm1, %v296_v26 }
  0x9b   : > { %320 = vst.msk [vmem:[%s570_s30 + $0x18] sm:$0xff] %vm316_vm1, %v302_v27 }
  0x9c   : > { %v307_v30 = vpop.f32.mrf.mxu2  ;;  %v313_v31 = vpop.f32.mrf.mxu3 }
  0x9d   : > { %v308_v32 = vadd.f32 %v307_v30, %v247_v28  ;;  %v314_v33 = vadd.f32 %v313_v31, %v249_v29 }
  0x9f   : > { %322 = vst.msk [vmem:[%s570_s30 + $0x28] sm:$0xff] %vm316_vm1, %v308_v32 }
  0xa0   : > { %324 = vst.msk [vmem:[%s570_s30 + $0x38] sm:$0xff] %vm316_vm1, %v314_v33 }
  0xa1 PF: > { %s13_s14 = sadd.s32 1, %s501_s14   ;;  %s619_s12 = smov %s497_s13 }
  0xa2   : > { %p10_p5 = scmp.ge.s32.totalorder %s13_s14, 4   ;;  %s620_s13 = smov %s622_s15 }
  0xa4   :  { %12 = sbr.rel (!%p10_p5) target bundleno = 2 (0x2), region = 65 }

</bundles_post_ra>
